<compile_context>
chip_gen: v7x
topology: tpu7x:2x2x1
jax: 0.10.0
libtpu: 0.0.40
codegen_flags: <defaults>
</compile_context>

<pallas_src>
import jax
import jax.numpy as jnp
from jax.experimental import pallas as pl
from jax.experimental.pallas import tpu as pltpu


def _round_up(n, m):
    return ((n + m - 1) // m) * m


def _mlp_kernel(x_ref,
                w1_ref, b1_ref,
                w2_ref, b2_ref,
                w3_ref, b3_ref,
                w4_ref, b4_ref,
                o_ref):
    # x_ref: [F, TB] f32 (batch on lanes). Cast to bf16 for the MXU passes.
    x = x_ref[...].astype(jnp.bfloat16)

    # fc1 / fc2 / fc3: y = W @ h + b, bf16 inputs, f32 accumulation, ReLU on VPU.
    h = jnp.dot(w1_ref[...], x, preferred_element_type=jnp.float32) + b1_ref[...]
    h = jnp.maximum(h, 0.0)                                            # [64, TB] f32
    h = jnp.dot(w2_ref[...], h.astype(jnp.bfloat16),
                preferred_element_type=jnp.float32) + b2_ref[...]
    h = jnp.maximum(h, 0.0)                                            # [32, TB] f32
    h = jnp.dot(w3_ref[...], h.astype(jnp.bfloat16),
                preferred_element_type=jnp.float32) + b3_ref[...]
    h = jnp.maximum(h, 0.0)                                            # [16, TB] f32

    # fc4 (in=16, out=1): elementwise multiply by the [16, 1] weight column and
    # reduce over the sublane (feature) axis instead of a <1%-utilized MXU pass.
    out = jnp.sum(w4_ref[...] * h, axis=0, keepdims=True) + b4_ref[...]  # [1, TB]
    o_ref[...] = out.astype(o_ref.dtype)


def aqi_predictor_forward(x, params, *, tb=1024):
    """x: [B, input_size] float32. Returns [B, 1] float32.

    params layout (see init_params):
      fc1/fc2/fc3: (W [out, in] bf16, b [out, 1] f32)
      fc4:         (w [16, 1]   f32,  b [1, 1]   f32)
    """
    B, F = x.shape
    w1, b1 = params["fc1"]
    w2, b2 = params["fc2"]
    w3, b3 = params["fc3"]
    w4, b4 = params["fc4"]

    # Batch tile: multiple of 128 (lane width), capped so tiny batches use one step.
    tb = min(tb, _round_up(max(B, 1), 128))
    b_pad = _round_up(B, tb)

    # Batch-on-lanes: [F, B_pad]; padded columns are zeros (harmless, dropped later).
    xt = jnp.zeros((F, b_pad), jnp.float32).at[:, :B].set(x.T)

    def _resident(arr):
        # Full-array block, constant block index -> DMA'd once, stays in VMEM.
        return pl.BlockSpec(arr.shape, lambda i: (0, 0))

    out_t = pl.pallas_call(
        _mlp_kernel,
        out_shape=jax.ShapeDtypeStruct((1, b_pad), jnp.float32),
        grid_spec=pltpu.PrefetchScalarGridSpec(
            num_scalar_prefetch=0,
            grid=(b_pad // tb,),
            in_specs=[
                pl.BlockSpec((F, tb), lambda i: (0, i)),   # x tile, pipelined
                _resident(w1), _resident(b1),
                _resident(w2), _resident(b2),
                _resident(w3), _resident(b3),
                _resident(w4), _resident(b4),
            ],
            out_specs=pl.BlockSpec((1, tb), lambda i: (0, i)),  # lane-dense output
        ),
        compiler_params=pltpu.CompilerParams(
            dimension_semantics=("parallel",),
        ),
    )(xt, w1, b1, w2, b2, w3, b3, w4, b4)

    return out_t[:, :B].T  # [B, 1]


def init_params(key, input_size):
    """Synthetic init mimicking nn.Linear's U(-1/sqrt(fan_in), +1/sqrt(fan_in)).

    Weights are stored PyTorch-native [out, in] (bf16 for the MXU layers); the
    final layer's weight is stored as a [16, 1] f32 column for the VPU path.
    Biases are stored as [out, 1] f32 so they broadcast over the lane (batch) axis.
    """
    sizes = [(input_size, 64), (64, 32), (32, 16), (16, 1)]
    names = ["fc1", "fc2", "fc3", "fc4"]
    params = {}
    for name, (fan_in, fan_out) in zip(names, sizes):
        key, kw, kb = jax.random.split(key, 3)
        bound = 1.0 / jnp.sqrt(jnp.float32(fan_in))
        w = jax.random.uniform(kw, (fan_out, fan_in), jnp.float32, -bound, bound)
        b = jax.random.uniform(kb, (fan_out, 1), jnp.float32, -bound, bound)
        if name == "fc4":
            params[name] = (w.T.astype(jnp.float32), b)      # [16, 1] f32
        else:
            params[name] = (w.astype(jnp.bfloat16), b)       # [out, in] bf16
    return params


def _reference_forward(x, params):
    """Pure-JAX f32 reference using the same stored weights (y = x @ W.T + b.T)."""
    h = x
    for name in ["fc1", "fc2", "fc3"]:
        w, b = params[name]
        h = jnp.maximum(h @ w.astype(jnp.float32).T + b.T, 0.0)
    w4, b4 = params["fc4"]                                   # w4: [16, 1]
    return h @ w4.astype(jnp.float32) + b4.T


if __name__ == "__main__":
    key = jax.random.PRNGKey(0)
    input_size = 5   # ['Year','Month','Day','Country_...','Status_Moderate']
    batch = 8

    key, kx = jax.random.split(key)
    x = jax.random.normal(kx, (batch, input_size), jnp.float32)  # pre-normalized features

    params = init_params(key, input_size)

    # Small-batch run (single grid step, batch padded to 128 lanes).
    out = aqi_predictor_forward(x, params)
    out = jax.block_until_ready(out)
    ref = _reference_forward(x, params)
    assert out.shape == (batch, 1)
    # bf16 matmul inputs with f32 accumulation -> loose-but-meaningful tolerance.
    assert jnp.allclose(out, ref, atol=2e-2, rtol=2e-2), "mismatch vs reference (B=8)"

    # Multi-step grid check (exercises pipelined batch tiling + padding drop).
    key, kx2 = jax.random.split(key)
    x2 = jax.random.normal(kx2, (384, input_size), jnp.float32)
    out2 = jax.block_until_ready(aqi_predictor_forward(x2, params, tb=128))
    ref2 = _reference_forward(x2, params)
    assert out2.shape == (384, 1)
    assert jnp.allclose(out2, ref2, atol=2e-2, rtol=2e-2), "mismatch vs reference (B=384)"

    print("KERNEL_OK")
</pallas_src>

<mosaic_0001>
module attributes {stable_mosaic.version = 11 : i64} {
  func.func @_mlp_kernel(%arg0: i32, %arg1: memref<5x128xf32, #tpu.memory_space<vmem>>, %arg2: memref<64x5xbf16, #tpu.memory_space<vmem>>, %arg3: memref<64x1xf32, #tpu.memory_space<vmem>>, %arg4: memref<32x64xbf16, #tpu.memory_space<vmem>>, %arg5: memref<32x1xf32, #tpu.memory_space<vmem>>, %arg6: memref<16x32xbf16, #tpu.memory_space<vmem>>, %arg7: memref<16x1xf32, #tpu.memory_space<vmem>>, %arg8: memref<16x1xf32, #tpu.memory_space<vmem>>, %arg9: memref<1x1xf32, #tpu.memory_space<vmem>>, %arg10: memref<1x128xf32, #tpu.memory_space<vmem>>) attributes {dimension_semantics = [#tpu.dimension_semantics<parallel>], iteration_bounds = array<i64: 1>, scalar_prefetch = 0 : i64, scratch_operands = 0 : i64, tpu.core_type = #tpu.core_type<tc>, window_params = [{transform_indices = @transform_0, window_bounds = array<i64: 5, 128>}, {pipeline_mode = #tpu.pipeline_mode<synchronous>, transform_indices = @transform_1, window_bounds = array<i64: 64, 5>}, {pipeline_mode = #tpu.pipeline_mode<synchronous>, transform_indices = @transform_2, window_bounds = array<i64: 64, 1>}, {pipeline_mode = #tpu.pipeline_mode<synchronous>, transform_indices = @transform_3, window_bounds = array<i64: 32, 64>}, {pipeline_mode = #tpu.pipeline_mode<synchronous>, transform_indices = @transform_4, window_bounds = array<i64: 32, 1>}, {pipeline_mode = #tpu.pipeline_mode<synchronous>, transform_indices = @transform_5, window_bounds = array<i64: 16, 32>}, {pipeline_mode = #tpu.pipeline_mode<synchronous>, transform_indices = @transform_6, window_bounds = array<i64: 16, 1>}, {pipeline_mode = #tpu.pipeline_mode<synchronous>, transform_indices = @transform_7, window_bounds = array<i64: 16, 1>}, {pipeline_mode = #tpu.pipeline_mode<synchronous>, transform_indices = @transform_8, window_bounds = array<i64: 1, 1>}, {transform_indices = @transform_9, window_bounds = array<i64: 1, 128>}]} {
    %c0 = arith.constant 0 : index
    %c0_0 = arith.constant 0 : index
    %0 = vector.load %arg1[%c0, %c0_0] : memref<5x128xf32, #tpu.memory_space<vmem>>, vector<5x128xf32>
    %1 = arith.truncf %0 : vector<5x128xf32> to vector<5x128xbf16>
    %c0_1 = arith.constant 0 : index
    %c0_2 = arith.constant 0 : index
    %2 = vector.load %arg2[%c0_1, %c0_2] : memref<64x5xbf16, #tpu.memory_space<vmem>>, vector<64x5xbf16>
    %cst = arith.constant dense<0.000000e+00> : vector<64x128xf32>
    %3 = tpu.matmul %2, %1, %cst {dimension_numbers = #tpu.dot_dimension_numbers<[1], [0], [0], [1], [0, 0, 1, 1], [], []>} : vector<64x5xbf16>, vector<5x128xbf16>, vector<64x128xf32> -> vector<64x128xf32>
    %c0_3 = arith.constant 0 : index
    %c0_4 = arith.constant 0 : index
    %4 = vector.load %arg3[%c0_3, %c0_4] : memref<64x1xf32, #tpu.memory_space<vmem>>, vector<64x1xf32>
    %5 = vector.broadcast %4 : vector<64x1xf32> to vector<64x128xf32>
    %6 = arith.addf %3, %5 : vector<64x128xf32>
    %cst_5 = arith.constant 0.000000e+00 : f32
    %7 = vector.broadcast %cst_5 : f32 to vector<64x128xf32>
    %8 = arith.maximumf %6, %7 : vector<64x128xf32>
    %c0_6 = arith.constant 0 : index
    %c0_7 = arith.constant 0 : index
    %9 = vector.load %arg4[%c0_6, %c0_7] : memref<32x64xbf16, #tpu.memory_space<vmem>>, vector<32x64xbf16>
    %10 = arith.truncf %8 : vector<64x128xf32> to vector<64x128xbf16>
    %cst_8 = arith.constant dense<0.000000e+00> : vector<32x128xf32>
    %11 = tpu.matmul %9, %10, %cst_8 {dimension_numbers = #tpu.dot_dimension_numbers<[1], [0], [0], [1], [0, 0, 1, 1], [], []>} : vector<32x64xbf16>, vector<64x128xbf16>, vector<32x128xf32> -> vector<32x128xf32>
    %c0_9 = arith.constant 0 : index
    %c0_10 = arith.constant 0 : index
    %12 = vector.load %arg5[%c0_9, %c0_10] : memref<32x1xf32, #tpu.memory_space<vmem>>, vector<32x1xf32>
    %13 = vector.broadcast %12 : vector<32x1xf32> to vector<32x128xf32>
    %14 = arith.addf %11, %13 : vector<32x128xf32>
    %cst_11 = arith.constant 0.000000e+00 : f32
    %15 = vector.broadcast %cst_11 : f32 to vector<32x128xf32>
    %16 = arith.maximumf %14, %15 : vector<32x128xf32>
    %c0_12 = arith.constant 0 : index
    %c0_13 = arith.constant 0 : index
    %17 = vector.load %arg6[%c0_12, %c0_13] : memref<16x32xbf16, #tpu.memory_space<vmem>>, vector<16x32xbf16>
    %18 = arith.truncf %16 : vector<32x128xf32> to vector<32x128xbf16>
    %cst_14 = arith.constant dense<0.000000e+00> : vector<16x128xf32>
    %19 = tpu.matmul %17, %18, %cst_14 {dimension_numbers = #tpu.dot_dimension_numbers<[1], [0], [0], [1], [0, 0, 1, 1], [], []>} : vector<16x32xbf16>, vector<32x128xbf16>, vector<16x128xf32> -> vector<16x128xf32>
    %c0_15 = arith.constant 0 : index
    %c0_16 = arith.constant 0 : index
    %20 = vector.load %arg7[%c0_15, %c0_16] : memref<16x1xf32, #tpu.memory_space<vmem>>, vector<16x1xf32>
    %21 = vector.broadcast %20 : vector<16x1xf32> to vector<16x128xf32>
    %22 = arith.addf %19, %21 : vector<16x128xf32>
    %cst_17 = arith.constant 0.000000e+00 : f32
    %23 = vector.broadcast %cst_17 : f32 to vector<16x128xf32>
    %24 = arith.maximumf %22, %23 : vector<16x128xf32>
    %c0_18 = arith.constant 0 : index
    %c0_19 = arith.constant 0 : index
    %25 = vector.load %arg8[%c0_18, %c0_19] : memref<16x1xf32, #tpu.memory_space<vmem>>, vector<16x1xf32>
    %26 = vector.broadcast %25 : vector<16x1xf32> to vector<16x128xf32>
    %27 = arith.mulf %26, %24 : vector<16x128xf32>
    %cst_20 = arith.constant dense<0.000000e+00> : vector<128xf32>
    %28 = vector.multi_reduction <add>, %27, %cst_20 [0] : vector<16x128xf32> to vector<128xf32>
    %29 = vector.shape_cast %28 : vector<128xf32> to vector<1x128xf32>
    %c0_21 = arith.constant 0 : index
    %c0_22 = arith.constant 0 : index
    %30 = vector.load %arg9[%c0_21, %c0_22] : memref<1x1xf32, #tpu.memory_space<vmem>>, vector<1x1xf32>
    %31 = vector.broadcast %30 : vector<1x1xf32> to vector<1x128xf32>
    %32 = arith.addf %29, %31 : vector<1x128xf32>
    %c0_23 = arith.constant 0 : index
    %c0_24 = arith.constant 0 : index
    %33 = vector.load %arg10[%c0_23, %c0_24] : memref<1x128xf32, #tpu.memory_space<vmem>>, vector<1x128xf32>
    tpu.vector_store %arg10[%c0_23, %c0_24], %32 {strides = array<i32>} : memref<1x128xf32, #tpu.memory_space<vmem>>, vector<1x128xf32>,
    return
  }
  func.func @transform_0(%arg0: i32) -> (i32, i32) {
    %c0_i32 = arith.constant 0 : i32
    %c0_i32_0 = arith.constant 0 : i32
    return %c0_i32, %arg0 : i32, i32
  }
  func.func @transform_1(%arg0: i32) -> (i32, i32) {
    %c0_i32 = arith.constant 0 : i32
    %c0_i32_0 = arith.constant 0 : i32
    %c0_i32_1 = arith.constant 0 : i32
    return %c0_i32, %c0_i32_0 : i32, i32
  }
  func.func @transform_2(%arg0: i32) -> (i32, i32) {
    %c0_i32 = arith.constant 0 : i32
    %c0_i32_0 = arith.constant 0 : i32
    %c0_i32_1 = arith.constant 0 : i32
    return %c0_i32, %c0_i32_0 : i32, i32
  }
  func.func @transform_3(%arg0: i32) -> (i32, i32) {
    %c0_i32 = arith.constant 0 : i32
    %c0_i32_0 = arith.constant 0 : i32
    %c0_i32_1 = arith.constant 0 : i32
    return %c0_i32, %c0_i32_0 : i32, i32
  }
  func.func @transform_4(%arg0: i32) -> (i32, i32) {
    %c0_i32 = arith.constant 0 : i32
    %c0_i32_0 = arith.constant 0 : i32
    %c0_i32_1 = arith.constant 0 : i32
    return %c0_i32, %c0_i32_0 : i32, i32
  }
  func.func @transform_5(%arg0: i32) -> (i32, i32) {
    %c0_i32 = arith.constant 0 : i32
    %c0_i32_0 = arith.constant 0 : i32
    %c0_i32_1 = arith.constant 0 : i32
    return %c0_i32, %c0_i32_0 : i32, i32
  }
  func.func @transform_6(%arg0: i32) -> (i32, i32) {
    %c0_i32 = arith.constant 0 : i32
    %c0_i32_0 = arith.constant 0 : i32
    %c0_i32_1 = arith.constant 0 : i32
    return %c0_i32, %c0_i32_0 : i32, i32
  }
  func.func @transform_7(%arg0: i32) -> (i32, i32) {
    %c0_i32 = arith.constant 0 : i32
    %c0_i32_0 = arith.constant 0 : i32
    %c0_i32_1 = arith.constant 0 : i32
    return %c0_i32, %c0_i32_0 : i32, i32
  }
  func.func @transform_8(%arg0: i32) -> (i32, i32) {
    %c0_i32 = arith.constant 0 : i32
    %c0_i32_0 = arith.constant 0 : i32
    %c0_i32_1 = arith.constant 0 : i32
    return %c0_i32, %c0_i32_0 : i32, i32
  }
  func.func @transform_9(%arg0: i32) -> (i32, i32) {
    %c0_i32 = arith.constant 0 : i32
    %c0_i32_0 = arith.constant 0 : i32
    return %c0_i32, %arg0 : i32, i32
  }
}

</mosaic_0001>

<bundles_post_ra>
// kernel: tpu_custom_call.1
= control target key start
LH: loop header
LB: loop body
LE: loop exit
PB: predicated region body
PF: predicated region fallthrough
CT: control target
= control target key end

     0   :  { %s668_s0 = inlined_call_operand.vmem [shape: f32[5,128], index: 0, kind: input, shape index: {}]   ;;  %s669_s1 = inlined_call_operand.vmem [shape: bf16[64,5], index: 1, kind: input, shape index: {}]   ;;  %s670_s2 = inlined_call_operand.vmem [shape: f32[64,1], index: 2, kind: input, shape index: {}]   ;;  %s671_s3 = inlined_call_operand.vmem [shape: bf16[32,64], index: 3, kind: input, shape index: {}]   ;;  %s672_s4 = inlined_call_operand.vmem [shape: f32[32,1], index: 4, kind: input, shape index: {}]   ;;  %s673_s5 = inlined_call_operand.vmem [shape: bf16[16,32], index: 5, kind: input, shape index: {}]   ;;  %s674_s6 = inlined_call_operand.vmem [shape: f32[16,1], index: 6, kind: input, shape index: {}]   ;;  %s675_s7 = inlined_call_operand.vmem [shape: f32[16,1], index: 7, kind: input, shape index: {}]   ;;  %s676_s8 = inlined_call_operand.<no memory space> [shape: f32[1,1], index: 8, kind: input, shape index: {}]   ;;  %s677_s9 = inlined_call_operand.hbm [shape: f32[1,128], index: 9, kind: output, shape index: {}]  }
   0x1   :  { %v14_v0 = vstv %s676_s8 }
   0x2   :  { %15 = vst [vmem:[#allocation2] sm:$0x1] %v14_v0 }
   0x3   :  { %v36_v1 = vld [vmem:[%s668_s0] sm:$0x1f]  ;;  %vm127_vm0 = vcmask 1041408   ;;  %vm128_vm1 = vcmask 1042432   ;;  %v520_v4 = vmov 65535   ;;  %vm114_vm2 = vcmask 39936  }
   0x4   :  { %v489_v2 = vld [vmem:[%s669_s1] sm:$0xff]   ;;  %v37_v3 = vpack.c.bf16 %v36_v1, %v36_v1  ;;  %v129_v5 = vsel %vm127_vm0, 4294967295, %v520_v4  ;;  %v521_v8 = vmov 0   ;;  %v490_v9 = vld [vmem:[%s669_s1 + $0x8] sm:$0xff]   ;;  %v48_v11 = vld [vmem:[%s670_s2 + $0x10] sm:$0xff] }
   0x5   :  { %v130_v6 = vsel %vm128_vm1, %v129_v5, 0  ;;  %454 = vmatprep.mubr.msk.bf16.mxu0 %vm114_vm2, %v489_v2  ;;  %487 = vset.pattern.permute.xlu0 %v521_v8  ;;  %v46_v10 = vld [vmem:[%s670_s2] sm:$0xff]  ;;  %v491_v12 = vld [vmem:[%s669_s1 + $0x10] sm:$0xff]   ;;  %v47_v13 = vld [vmem:[%s670_s2 + $0x8] sm:$0xff] }
   0x6   :  { %v132_v7 = vand.u32 %v130_v6, %v37_v3  ;;  %488 = vset.pattern.permute.xlu1 %v521_v8  ;;  %56 = vperm.xlu0 %487, %v46_v10   ;;  %v49_v14 = vld [vmem:[%s670_s2 + $0x18] sm:$0xff]  ;;  %v50_v15 = vld [vmem:[%s670_s2 + $0x20] sm:$0xff]  ;;  %v51_v16 = vld [vmem:[%s670_s2 + $0x28] sm:$0xff] }
   0x7   :  { %66 = vperm.xlu1 %488, %v48_v11  }
   0x8   :  { %452 = vmatprep.subr.bf16.mxu0 %v132_v7 }
   0x9   :  { %453 = vmatpush3.bf16.msra.mxu0 %v132_v7 }
   0xa   :  { %61 = vperm.xlu0 %487, %v47_v13  }
   0xb   :  { %71 = vperm.xlu1 %488, %v49_v14  }
   0xc   :  { %455 = vmatmul.mubr.msk.bf16.vlgmr.msra.gmra.mrb[0].mxu0 %vm114_vm2, %v490_v9 }
   0xd   :  { %458 = vmatprep.mubr.msk.bf16.mxu0 %vm114_vm2, %v491_v12 }
   0xe   :  { %16 = vsyncpa [#allocation4], 0  ;;  %v492_v17 = vld [vmem:[%s669_s1 + $0x18] sm:$0xff]   ;;  %76 = vperm.xlu0 %487, %v50_v15   ;;  %v52_v18 = vld [vmem:[%s670_s2 + $0x30] sm:$0xff]  ;;  %vm249_vm3 = vcmask 523264   ;;  %v522_v3 = vmov 0.0  }
   0xf   :  { %81 = vperm.xlu1 %488, %v51_v16   ;;  %v53_v19 = vld [vmem:[%s670_s2 + $0x38] sm:$0xff]  ;;  %v215_v20 = vld [vmem:[%s672_s4] sm:$0xff]  ;;  %v216_v21 = vld [vmem:[%s672_s4 + $0x8] sm:$0xff]  ;;  %474 = vmatprep.subr.bf16.mxu0 %v522_v3  ;;  %vm523_vm4 = vmmov 0   ;;  %vm330_vm5 = vcmask 261120  }
  0x10   :  { %v217_v22 = vld [vmem:[%s672_s4 + $0x10] sm:$0xff]  ;;  %v218_v23 = vld [vmem:[%s672_s4 + $0x18] sm:$0xff]  ;;  %v313_v24 = vld [vmem:[%s674_s6] sm:$0xff] }
  0x11   :  { %v314_v25 = vld [vmem:[%s674_s6 + $0x8] sm:$0xff]  ;;  %v377_v26 = vld [vmem:[%s675_s7] sm:$0xff] }
  0x12   :  { %86 = vperm.xlu0 %487, %v52_v18   ;;  %v378_v27 = vld [vmem:[%s675_s7 + $0x8] sm:$0xff]  ;;  %v398_v28 = vld [vmem:[#allocation2] sm:$0x1] }
  0x13   :  { %91 = vperm.xlu1 %488, %v53_v19   ;;  %v493_v29 = vld [vmem:[%s671_s3] sm:$0xff]   ;;  %v494_v2 = vld [vmem:[%s671_s3 + $0x8] sm:$0xff]  }
  0x14   :  { %459 = vmatmul.mubr.msk.bf16.gmra.mrb[4].mxu0 %vm114_vm2, %v492_v17  ;;  %470 = vmatprep.mubr.msk.bf16.mxu1 %vm249_vm3, %v493_v29 }
  0x15   :  { %478 = vmatprep.mubr.msk.bf16.mxu0 %vm523_vm4, %v522_v3 }
  0x16   :  { %221 = vperm.xlu0 %487, %v215_v20  }
  0x17   :  { %226 = vperm.xlu1 %488, %v216_v21  }
  0x1a   :  { %231 = vperm.xlu0 %487, %v217_v22   ;;  %v495_v22 = vld [vmem:[%s673_s5] sm:$0xff]   ;;  %s524_s5 = smov [#allocation3]  }
  0x1b   :  { %236 = vperm.xlu1 %488, %v218_v23   ;;  %s416_s28 = sshll.u32 %s524_s5, 4  ;;  %s417_s28 = int_to_ptr.vmem [resolvable:$true] %s416_s28 }
  0x1c   :  { %s496_s29 = scalar_lea.vmem %s417_s28, 16  ;;  %s500_s30 = scalar_lea.vmem %s417_s28, 32 }
  0x1d   :  { %p497_p0 = scmp.ne.s32.totalorder %s417_s28, %s496_s29  ;;  %p501_p1 = scmp.lt.s32.totalorder %s417_s28, %s417_s28 }
  0x1e   :  { %317 = vperm.xlu0 %487, %v313_v24   ;;  %p502_p2 = scmp.lt.s32.totalorder %s500_s30, %s496_s29 }
  0x1f   :  { %322 = vperm.xlu1 %488, %v314_v25  }
  0x20   :  { %p503_p3 = por %p502_p2, %p501_p1 }
  0x22   :  { %381 = vperm.xlu0 %487, %v377_v26   ;;  %p504_p4 = pnand %p503_p3, %p497_p0 }
  0x23   :  { %386 = vperm.xlu1 %488, %v378_v27  }
  0x26   :  { %401 = vperm.xlu0 %487, %v398_v28  }
  0x85   :  { %v57_v30 = vpop.permute.xlu0 %56 }
  0x86   :  { %v67_v31 = vpop.permute.xlu1 %66 }
  0x89   :  { %v62_v32 = vpop.permute.xlu0 %61 }
  0x8a   :  { %v72_v33 = vpop.permute.xlu1 %71 }
  0x8d   :  { %v77_v37 = vpop.permute.xlu0 %76 }
  0x8e   :  { %v82_v42 = vpop.permute.xlu1 %81 }
  0x91   :  { %v87_v49 = vpop.permute.xlu0 %86 }
  0x92   :  { %v92_v54 = vpop.permute.xlu1 %91 }
  0x95   :  { %v222_v4 = vpop.permute.xlu0 %221 }
  0x96   :  { %v227_v5 = vpop.permute.xlu1 %226 }
  0x99   :  { %v232_v6 = vpop.permute.xlu0 %231 }
  0x9a   :  { %v237_v10 = vpop.permute.xlu1 %236 }
  0x9d   :  { %v318_v23 = vpop.permute.xlu0 %317 }
  0x9e   :  { %v323_v24 = vpop.permute.xlu1 %322 }
  0xdf   :  { %v456_v34 = vpop.f32.mrb[0].mxu0 }
  0xe0   :  { %v177_v35 = vadd.f32 %v456_v34, %v67_v31  ;;  %v168_v36 = vpop.f32.mrb[1].mxu0  ;;  %v387_v34 = vpop.permute.xlu1 %386 }
  0xe1   :  { %v169_v38 = vadd.f32 %v168_v36, %v57_v30  ;;  %v457_v39 = vpop.f32.mrb[2].mxu0 }
  0xe2   :  { %v180_v40 = vadd.f32 %v457_v39, %v72_v33  ;;  %v171_v41 = vpop.f32.mrb[3].mxu0  ;;  %v201_v44 = vmax.f32 %v177_v35, 0.0  ;;  %v382_v33 = vpop.permute.xlu0 %381 }
  0xe3   :  { %v172_v43 = vadd.f32 %v171_v41, %v62_v32  ;;  %v199_v46 = vmax.f32 %v169_v38, 0.0 }
  0xe4   :  { %v202_v45 = vmax.f32 %v180_v40, 0.0 }
  0xe5   :  { %v200_v47 = vmax.f32 %v172_v43, 0.0 }
  0xe6   :  { %v212_v48 = vpack.c.bf16 %v202_v45, %v201_v44  ;;  %v402_v45 = vpop.permute.xlu0 %401 }
  0xe7   :  { %v460_v50 = vpop.f32.mrb[4].mxu0  ;;  %v211_v51 = vpack.c.bf16 %v200_v47, %v199_v46 }
  0xe8   :  { %v193_v52 = vadd.f32 %v460_v50, %v87_v49  ;;  %v184_v53 = vpop.f32.mrb[5].mxu0 }
  0xe9   :  { %v185_v55 = vadd.f32 %v184_v53, %v77_v37  ;;  %v461_v56 = vpop.f32.mrb[6].mxu0  ;;  %462 = vmatprep.subr.bf16.mxu1 %v211_v51  ;;  %v404_v37 = vlaneseq }
  0xea   :  { %v196_v57 = vadd.f32 %v461_v56, %v92_v54  ;;  %v187_v58 = vpop.f32.mrb[7].mxu0  ;;  %463 = vmatpush3.bf16.msra.mxu1 %v211_v51  ;;  %v205_v60 = vmax.f32 %v193_v52, 0.0 }
  0xeb   :  { %v188_v59 = vadd.f32 %v187_v58, %v82_v42  ;;  %464 = vmatprep.subr.bf16.mxu1 %v212_v48  ;;  %v203_v62 = vmax.f32 %v185_v55, 0.0  ;;  %v405_v40 = vshrl.u32 %v404_v37, 7 }
  0xec   :  { %v206_v61 = vmax.f32 %v196_v57, 0.0 }
  0xed   :  { %v204_v63 = vmax.f32 %v188_v59, 0.0  ;;  %v406_v43 = vsub.s32 0, %v405_v40 }
  0xee   :  { %v214_v0 = vpack.c.bf16 %v206_v61, %v205_v60  ;;  %465 = vmatpush3.bf16.msra.mxu1 %v212_v48 }
  0xef   :  { %v213_v1 = vpack.c.bf16 %v204_v63, %v203_v62  ;;  %v407_v47 = vrot.slane %v402_v45, %v406_v43 }
  0xf1   :  { %466 = vmatprep.subr.bf16.mxu1 %v213_v1 }
  0xf2   :  { %467 = vmatpush3.bf16.msra.mxu1 %v213_v1 }
  0xf3   :  { %468 = vmatprep.subr.bf16.mxu1 %v214_v0 }
  0xf6   :  { %469 = vmatpush3.bf16.msra.mxu1 %v214_v0 }
  0xf9   :  { %471 = vmatmul.mubr.msk.bf16.vlgmr.msra.gmra.mrb[0].mxu1 %vm249_vm3, %v494_v2 }
 0x1cc   :  { %v472_v7 = vpop.f32.mrb[0].mxu1 }
 0x1cd   :  { %v299_v8 = vadd.f32 %v472_v7, %v232_v6  ;;  %v290_v9 = vpop.f32.mrb[1].mxu1 }
 0x1ce   :  { %v291_v11 = vadd.f32 %v290_v9, %v222_v4  ;;  %v473_v12 = vpop.f32.mrb[2].mxu1 }
 0x1cf   :  { %v302_v13 = vadd.f32 %v473_v12, %v237_v10  ;;  %v293_v14 = vpop.f32.mrb[3].mxu1  ;;  %v307_v16 = vmax.f32 %v299_v8, 0.0 }
 0x1d0   :  { %v294_v15 = vadd.f32 %v293_v14, %v227_v5  ;;  %v305_v18 = vmax.f32 %v291_v11, 0.0 }
 0x1d1   :  { %v308_v17 = vmax.f32 %v302_v13, 0.0 }
 0x1d2   :  { %v306_v19 = vmax.f32 %v294_v15, 0.0 }
 0x1d3   :  { %v312_v20 = vpack.c.bf16 %v308_v17, %v307_v16 }
 0x1d4   :  { %v311_v21 = vpack.c.bf16 %v306_v19, %v305_v18 }
 0x1d6   :  { %475 = vmatpush3.bf16.msra.mxu0 %v311_v21 }
 0x1d7   :  { %476 = vmatprep.subr.bf16.mxu0 %v522_v3 }
 0x1da   :  { %477 = vmatpush3.bf16.msra.mxu0 %v312_v20 }
 0x1dd   :  { %479 = vmatmul.mubr.msk.bf16.vlgmr.msra.gmra.mrb[8].mxu0 %vm330_vm5, %v495_v22 }
 0x2b0   :  { %v368_v25 = vpop.f32.mrb[8].mxu0 }
 0x2b1   :  { %v369_v26 = vadd.f32 %v368_v25, %v318_v23  ;;  %v480_v27 = vpop.f32.mrb[9].mxu0 }
 0x2b2   :  { %v371_v28 = vpop.f32.mrb[10].mxu0 }
 0x2b3   :  { %v375_v29 = vmax.f32 %v369_v26, 0.0  ;;  %v372_v30 = vadd.f32 %v371_v28, %v323_v24  ;;  %v481_v31 = vpop.f32.mrb[11].mxu0 }
 0x2b5   :  { %v376_v32 = vmax.f32 %v372_v30, 0.0  ;;  %v389_v35 = vmul.f32 %v382_v33, %v375_v29 }
 0x2b7   :  { %v390_v36 = vmul.f32 %v387_v34, %v376_v32 }
 0x2b9   :  { %v391_v38 = vadd.f32 %v390_v36, %v389_v35 }
 0x2bb   :  { %v392_v39 = vrot.slane %v391_v38, 4 }
 0x2bd   :  { %v393_v41 = vadd.f32 %v392_v39, %v391_v38 }
 0x2bf   :  { %v394_v42 = vrot.slane %v393_v41, 2 }
 0x2c1   :  { %v395_v44 = vadd.f32 %v394_v42, %v393_v41 }
 0x2c3   :  { %v396_v46 = vrot.slane %v395_v44, 1 }
 0x2c5   :  { %v397_v48 = vadd.f32 %v396_v46, %v395_v44 }
 0x2c7   :  { %v408_v49 = vadd.f32 %v407_v47, %v397_v48 }
 0x2c9   :  { %409 = vst [vmem:[#allocation3] sm:$0x1] %v408_v49 }
 0x2ca   :  { %507 = shalt.err (!%p504_p4)
}
 0x2cb   :  { %s508_s12 = scalar_lea.hbm %s677_s9, 16 }
 0x2cc   :  { %p509_p5 = scmp.ne.s32.totalorder %s677_s9, %s508_s12  ;;  %p512_p6 = scmp.lt.u32.totalorder %s508_s12, %s677_s9 }
 0x2ce   :  { %p514_p7 = pnand %p512_p6, %p509_p5 }
 0x2d0   :  { %517 = shalt.err (!%p514_p7)
}
 0x2d1   :  { %419 = dma.vmem_to_hbm [thread:$0]  %s417_s28, 16, %s677_s9, [#allocation4]  }
 0x2d2   :  { %518 = dma.done.wait [#allocation4], 16  }
 0x2d3   :  { %519 = vsyncadd [#allocation4], 4294967280 }
 0x2d4   :  { %423 = vsyncpa [#allocation4], 1 }

</bundles_post_ra>
